<compile_context>
chip_gen: v6e
topology: v6e:2x2x1
jax: 0.10.0
libtpu: 0.0.40
codegen_flags: <defaults>
</compile_context>

<pallas_src>
import functools

import jax
import jax.numpy as jnp
from jax.experimental import pallas as pl
from jax.experimental.pallas import tpu as pltpu


def _space_to_depth_kernel(x_ref, q_ref, o_ref, *, bs, C, tho, Wo):
    """One (batch, row-tile) grid step.

    x_ref: (C, tho, bs*W)    input tile; lane k = b*W + w  <->  x[c, i*bs + b, w]
    q_ref: (bs*W, bs*W)      0/1 permutation; column m = (bh*bs+bw)*Wo + j has its
                             single 1 at row k = bh*W + j*bs + bw
    o_ref: (C*bs*bs, tho, Wo)
    """
    x = x_ref[...]                                     # (C, tho, bs*W)
    # Merge the leading dims (sublane-aligned relabel when tho % 8 == 0).
    x2 = x.reshape(C * tho, bs * Wo * bs)              # (C*tho, bs*W)
    # Exact one-hot permutation on the MXU:
    #   y[r, (bh*bs+bw)*Wo + j] = x2[r, bh*W + j*bs + bw]
    y = jnp.dot(x2, q_ref[...], preferred_element_type=jnp.float32)
    y = y.astype(o_ref.dtype)
    # Scatter the bs*bs spatial-offset groups into their output channel blocks.
    for t in range(bs * bs):                           # static unroll
        o_ref[t * C:(t + 1) * C, :, :] = (
            y[:, t * Wo:(t + 1) * Wo].reshape(C, tho, Wo))


def _pick_row_tile(Ho, row_bytes, target_bytes=1 << 20):
    """Largest tho (output rows per step) with tho | Ho, tile <= ~1 MiB, and
    tho % 8 == 0 when actually tiling (keeps blocks (8,128)-friendly)."""
    if Ho * row_bytes <= target_bytes:
        return Ho                      # whole plane per batch element fits
    best = Ho                          # correctness fallback if nothing aligns
    for t in range(8, Ho, 8):
        if Ho % t == 0 and t * row_bytes <= target_bytes:
            best = t                   # keep the largest qualifying divisor
    return best


def space_to_depth(x, block_size):
    """Pallas TPU equivalent of SpaceToDepth(block_size)(x) for NCHW input."""
    N, C, H, W = x.shape
    bs = int(block_size)
    assert H % bs == 0 and W % bs == 0, (H, W, bs)
    Ho, Wo = H // bs, W // bs

    # Free view of contiguous NCHW: lane index k = b*W + w <-> x[n, c, i*bs+b, w].
    x4 = x.reshape(N, C, Ho, bs * W)

    # Exact 0/1 lane-permutation matrix (constant under jit; DMA'd exactly once
    # thanks to the constant index_map below).
    m = jnp.arange(bs * W)
    t, j = m // Wo, m % Wo
    bh, bw = t // bs, t % bs
    src = bh * W + j * bs + bw                          # source lane of output lane m
    q = (jnp.arange(bs * W)[:, None] == src[None, :]).astype(x.dtype)

    # Row tiling: tho output rows (= tho*bs input rows) per grid step.
    row_bytes = C * bs * W * x.dtype.itemsize
    tho = _pick_row_tile(Ho, row_bytes)
    grid = (N, Ho // tho)

    kernel = functools.partial(_space_to_depth_kernel, bs=bs, C=C, tho=tho, Wo=Wo)
    return pl.pallas_call(
        kernel,
        out_shape=jax.ShapeDtypeStruct((N, C * bs * bs, Ho, Wo), x.dtype),
        grid=grid,
        in_specs=[
            pl.BlockSpec((None, C, tho, bs * W), lambda n, h: (n, 0, h, 0)),
            pl.BlockSpec((bs * W, bs * W), lambda n, h: (0, 0)),
        ],
        out_specs=pl.BlockSpec((None, C * bs * bs, tho, Wo),
                               lambda n, h: (n, 0, h, 0)),
        compiler_params=pltpu.CompilerParams(
            dimension_semantics=("parallel", "arbitrary")),
    )(x4, q)


def _space_to_depth_ref(x, bs):
    # Pure-JAX reference mirroring the PyTorch view/permute/view.
    N, C, H, W = x.shape
    y = x.reshape(N, C, H // bs, bs, W // bs, bs)
    y = jnp.transpose(y, (0, 3, 5, 1, 2, 4))
    return y.reshape(N, C * bs * bs, H // bs, W // bs)


if __name__ == "__main__":
    key = jax.random.PRNGKey(0)
    N, C, H, W = 2, 4, 16, 16
    block_size = 2
    # SpaceToDepth is pure data movement, so we check EXACT equality.  Integer-
    # valued f32 inputs keep that check exact regardless of how the MXU
    # decomposes the f32 one-hot matmul (x * 1.0 and + 0.0 are exact here).
    x = jax.random.randint(key, (N, C, H, W), -128, 128).astype(jnp.float32)

    fwd = jax.jit(space_to_depth, static_argnames="block_size")
    out = jax.block_until_ready(fwd(x, block_size=block_size))

    assert out.shape == (N, C * block_size ** 2, H // block_size, W // block_size), out.shape
    assert out.dtype == jnp.float32
    expected = _space_to_depth_ref(x, block_size)
    assert jnp.array_equal(out, expected), "mismatch vs reference"
    print("KERNEL_OK")
</pallas_src>

<mosaic_0001>
module attributes {stable_mosaic.version = 11 : i64} {
  func.func @_space_to_depth_kernel(%arg0: i32, %arg1: i32, %arg2: memref<1x4x8x32xf32, #tpu.memory_space<vmem>>, %arg3: memref<32x32xf32, #tpu.memory_space<vmem>>, %arg4: memref<1x16x8x8xf32, #tpu.memory_space<vmem>>) attributes {dimension_semantics = [#tpu.dimension_semantics<parallel>, #tpu.dimension_semantics<arbitrary>], iteration_bounds = array<i64: 2, 1>, scalar_prefetch = 0 : i64, scratch_operands = 0 : i64, tpu.core_type = #tpu.core_type<tc>, window_params = [{transform_indices = @transform_0, window_bounds = array<i64: 1, 4, 8, 32>}, {pipeline_mode = #tpu.pipeline_mode<synchronous>, transform_indices = @transform_1, window_bounds = array<i64: 32, 32>}, {transform_indices = @transform_2, window_bounds = array<i64: 1, 16, 8, 8>}]} {
    %c0 = arith.constant 0 : index
    %c0_0 = arith.constant 0 : index
    %c0_1 = arith.constant 0 : index
    %c0_2 = arith.constant 0 : index
    %0 = vector.load %arg2[%c0, %c0_0, %c0_1, %c0_2] : memref<1x4x8x32xf32, #tpu.memory_space<vmem>>, vector<1x4x8x32xf32>
    %1 = vector.shape_cast %0 : vector<1x4x8x32xf32> to vector<4x8x32xf32>
    %2 = vector.shape_cast %1 : vector<4x8x32xf32> to vector<32x32xf32>
    %c0_3 = arith.constant 0 : index
    %c0_4 = arith.constant 0 : index
    %3 = vector.load %arg3[%c0_3, %c0_4] : memref<32x32xf32, #tpu.memory_space<vmem>>, vector<32x32xf32>
    %cst = arith.constant dense<0.000000e+00> : vector<32x32xf32>
    %4 = tpu.matmul %2, %3, %cst {dimension_numbers = #tpu.dot_dimension_numbers<[1], [0], [0], [1], [0, 0, 1, 1], [], []>} : vector<32x32xf32>, vector<32x32xf32>, vector<32x32xf32> -> vector<32x32xf32>
    %5 = vector.extract_strided_slice %4 {offsets = [0, 0], sizes = [32, 8], strides = [1, 1]} : vector<32x32xf32> to vector<32x8xf32>
    %6 = vector.shape_cast %5 : vector<32x8xf32> to vector<4x8x8xf32>
    %c0_5 = arith.constant 0 : index
    %c0_6 = arith.constant 0 : index
    %c0_7 = arith.constant 0 : index
    %c0_8 = arith.constant 0 : index
    %7 = vector.load %arg4[%c0_5, %c0_6, %c0_7, %c0_8] : memref<1x16x8x8xf32, #tpu.memory_space<vmem>>, vector<1x4x8x8xf32>
    %8 = vector.shape_cast %7 : vector<1x4x8x8xf32> to vector<4x8x8xf32>
    %9 = vector.shape_cast %6 : vector<4x8x8xf32> to vector<1x4x8x8xf32>
    tpu.vector_store %arg4[%c0_5, %c0_6, %c0_7, %c0_8], %9 {strides = array<i32>} : memref<1x16x8x8xf32, #tpu.memory_space<vmem>>, vector<1x4x8x8xf32>,
    %10 = vector.extract_strided_slice %4 {offsets = [0, 8], sizes = [32, 8], strides = [1, 1]} : vector<32x32xf32> to vector<32x8xf32>
    %11 = vector.shape_cast %10 : vector<32x8xf32> to vector<4x8x8xf32>
    %c0_9 = arith.constant 0 : index
    %c4 = arith.constant 4 : index
    %c0_10 = arith.constant 0 : index
    %c0_11 = arith.constant 0 : index
    %12 = vector.load %arg4[%c0_9, %c4, %c0_10, %c0_11] : memref<1x16x8x8xf32, #tpu.memory_space<vmem>>, vector<1x4x8x8xf32>
    %13 = vector.shape_cast %12 : vector<1x4x8x8xf32> to vector<4x8x8xf32>
    %14 = vector.shape_cast %11 : vector<4x8x8xf32> to vector<1x4x8x8xf32>
    tpu.vector_store %arg4[%c0_9, %c4, %c0_10, %c0_11], %14 {strides = array<i32>} : memref<1x16x8x8xf32, #tpu.memory_space<vmem>>, vector<1x4x8x8xf32>,
    %15 = vector.extract_strided_slice %4 {offsets = [0, 16], sizes = [32, 8], strides = [1, 1]} : vector<32x32xf32> to vector<32x8xf32>
    %16 = vector.shape_cast %15 : vector<32x8xf32> to vector<4x8x8xf32>
    %c0_12 = arith.constant 0 : index
    %c8 = arith.constant 8 : index
    %c0_13 = arith.constant 0 : index
    %c0_14 = arith.constant 0 : index
    %17 = vector.load %arg4[%c0_12, %c8, %c0_13, %c0_14] : memref<1x16x8x8xf32, #tpu.memory_space<vmem>>, vector<1x4x8x8xf32>
    %18 = vector.shape_cast %17 : vector<1x4x8x8xf32> to vector<4x8x8xf32>
    %19 = vector.shape_cast %16 : vector<4x8x8xf32> to vector<1x4x8x8xf32>
    tpu.vector_store %arg4[%c0_12, %c8, %c0_13, %c0_14], %19 {strides = array<i32>} : memref<1x16x8x8xf32, #tpu.memory_space<vmem>>, vector<1x4x8x8xf32>,
    %20 = vector.extract_strided_slice %4 {offsets = [0, 24], sizes = [32, 8], strides = [1, 1]} : vector<32x32xf32> to vector<32x8xf32>
    %21 = vector.shape_cast %20 : vector<32x8xf32> to vector<4x8x8xf32>
    %c0_15 = arith.constant 0 : index
    %c12 = arith.constant 12 : index
    %c0_16 = arith.constant 0 : index
    %c0_17 = arith.constant 0 : index
    %22 = vector.load %arg4[%c0_15, %c12, %c0_16, %c0_17] : memref<1x16x8x8xf32, #tpu.memory_space<vmem>>, vector<1x4x8x8xf32>
    %23 = vector.shape_cast %22 : vector<1x4x8x8xf32> to vector<4x8x8xf32>
    %24 = vector.shape_cast %21 : vector<4x8x8xf32> to vector<1x4x8x8xf32>
    tpu.vector_store %arg4[%c0_15, %c12, %c0_16, %c0_17], %24 {strides = array<i32>} : memref<1x16x8x8xf32, #tpu.memory_space<vmem>>, vector<1x4x8x8xf32>,
    return
  }
  func.func @transform_0(%arg0: i32, %arg1: i32) -> (i32, i32, i32, i32) {
    %c0_i32 = arith.constant 0 : i32
    %c0_i32_0 = arith.constant 0 : i32
    %c0_i32_1 = arith.constant 0 : i32
    return %arg0, %c0_i32, %arg1, %c0_i32_0 : i32, i32, i32, i32
  }
  func.func @transform_1(%arg0: i32, %arg1: i32) -> (i32, i32) {
    %c0_i32 = arith.constant 0 : i32
    %c0_i32_0 = arith.constant 0 : i32
    %c0_i32_1 = arith.constant 0 : i32
    return %c0_i32, %c0_i32_0 : i32, i32
  }
  func.func @transform_2(%arg0: i32, %arg1: i32) -> (i32, i32, i32, i32) {
    %c0_i32 = arith.constant 0 : i32
    %c0_i32_0 = arith.constant 0 : i32
    %c0_i32_1 = arith.constant 0 : i32
    return %arg0, %c0_i32, %arg1, %c0_i32_0 : i32, i32, i32, i32
  }
}

</mosaic_0001>

<bundles_post_ra>
// kernel: space_to_depth.1
= control target key start
LH: loop header
LB: loop body
LE: loop exit
PB: predicated region body
PF: predicated region fallthrough
CT: control target
= control target key end

     0   :  { %s552_s9 = smov 0   ;;  %s554_s10 = smov 0   ;;  %s631_s0 = inlined_call_operand.vmem [shape: f32[2,4,8,32], index: 0, kind: input, shape index: {}]   ;;  %s632_s1 = inlined_call_operand.vmem [shape: f32[32,32], index: 1, kind: input, shape index: {}]   ;;  %s633_s2 = inlined_call_operand.vmem [shape: f32[2,16,8,8], index: 2, kind: output, shape index: {}]  }
   0x1   :  { %s556_s11 = smov 0  }
   0x2 LB: > { %s24_s12 = sadd.s32 1, %s528_s10  ;;  %p428_p0 = scmp.ge.s32.totalorder %s532_s11, 1  ;;  %s532_s11 = sphi %s556_s11, %s12_s11   ;;  %s528_s10 = sphi %s554_s10, %s635_s10   ;;  %s524_s9 = sphi %s552_s9, %s634_s9  }
   0x3   : > { %p26_p1 = scmp.ge.s32.totalorder %s24_s12, 2  ;;  %p131_p2 = scmp.lt.s32.totalorder %s532_s11, 3 }
   0x5   : > { %s637_s12 = smov (%p26_p1, %s24_s12), 0  ;;  %p132_p3 = pnand %p428_p0, %p131_p2 }
   0x6   : > { %p159_p4 = scmp.lt.s32.totalorder (!%p132_p3), %s524_s9, 1  ;;  %s534_s29 = smov (!%p132_p3), 120  }
   0x7   : > { %135 = sbr.rel (%p132_p3) target bundleno = 351 (0x15f), region = 28  ;;  %s535_s30 = smov (!%p132_p3), 112  }
   0x8   : > { %s536_s3 = smov (!%p132_p3), 104  }
   0xc   : > { %v182_v0 = vld [vmem:[%s632_s1 + $0x18] sm:$0xff]  ;;  %v181_v1 = vld [vmem:[%s632_s1 + $0x10] sm:$0xff]  ;;  %v180_v2 = vld [vmem:[%s632_s1 + $0x8] sm:$0xff]  ;;  %s639_s9 = smov (!%p159_p4, %s524_s9), 1  ;;  %vm183_vm0 = vcmask 261120   ;;  %vm281_vm1 = vcmask 64512  }
   0xd   : > { %461 = vmatprep.subr.mxu0 %v182_v0  ;;  %475 = vmatprep.subr.mxu1 %v182_v0  ;;  %v179_v3 = vld [vmem:[%s632_s1] sm:$0xff]  ;;  %s451_s21 = sshll.u32 %s639_s9, 5  ;;  %s452_s25 = sshll.u32 %s639_s9, 7 }
   0xe   : > { %462 = vmatpush3.msra.mxu0 %v182_v0  ;;  %479 = vmatpush3.msra.mxu1 %v182_v0  ;;  %s166_s24 = scalar_lea.vmem %s631_s0, %s451_s21  ;;  %s588_s28 = scalar_lea.vmem %s633_s2, %s452_s25 }
   0xf   : > { %463 = vmatprep.subr.mxu0 %v181_v1  ;;  %476 = vmatprep.subr.mxu1 %v181_v1  ;;  %v175_v4 = vld [vmem:[%s166_s24] sm:$0xff]  ;;  %v177_v5 = vld [vmem:[%s166_s24 + $0x10] sm:$0xff]  ;;  %v176_v6 = vld [vmem:[%s166_s24 + $0x8] sm:$0xff] }
  0x10   : > { %464 = vmatpush3.msra.mxu0 %v181_v1  ;;  %480 = vmatpush3.msra.mxu1 %v181_v1  ;;  %v178_v7 = vld [vmem:[%s166_s24 + $0x18] sm:$0xff] }
  0x11   : > { %465 = vmatprep.subr.mxu0 %v180_v2  ;;  %477 = vmatprep.subr.mxu1 %v180_v2 }
  0x12   : > { %466 = vmatpush3.msra.mxu0 %v180_v2  ;;  %481 = vmatpush3.msra.mxu1 %v180_v2 }
  0x13   : > { %467 = vmatprep.subr.mxu0 %v179_v3  ;;  %478 = vmatprep.subr.mxu1 %v179_v3 }
  0x14   : > { %468 = vmatpush3.msra.mxu0 %v179_v3  ;;  %482 = vmatpush3.msra.mxu1 %v179_v3 }
  0x15   : > { %469 = vmatprep.mubr.msk.f32.mxu0 %vm183_vm0, %v175_v4  ;;  %472 = vmatprep.mubr.msk.f32.mxu1 %vm183_vm0, %v177_v5 }
  0x16   : > { %470 = vmatmul.mubr.msk.f32.vlgmr.msra.gmra.mxu0 %vm183_vm0, %v176_v6  ;;  %473 = vmatmul.mubr.msk.f32.vlgmr.msra.gmra.mxu1 %vm183_vm0, %v178_v7 }
  0xd6   : > { %v471_v8 = vpop.f32.mrf.mxu0  ;;  %v474_v9 = vpop.f32.mrf.mxu1 }
  0xd7   : > { %283 = vst.msk [vmem:[%s588_s28 + $0x8] sm:$0xff] %vm281_vm1, %v471_v8  ;;  %285 = vst.msk [vmem:[%s588_s28 + $0x18] sm:$0xff] %vm281_vm1, %v474_v9  ;;  %296 = vrot.lane.b32.xlu1 %v474_v9, %s534_s29  ;;  %292 = vrot.lane.b32.xlu0 %v471_v8, %s534_s29 }
  0xd8   : > { %v262_v10 = vpop.f32.mrf.mxu0  ;;  %v272_v11 = vpop.f32.mrf.mxu1 }
  0xd9   : > { %282 = vst.msk [vmem:[%s588_s28] sm:$0xff] %vm281_vm1, %v262_v10  ;;  %284 = vst.msk [vmem:[%s588_s28 + $0x10] sm:$0xff] %vm281_vm1, %v272_v11 }
  0xdb   : > { %309 = vrot.lane.b32.xlu1 %v471_v8, %s535_s30  ;;  %290 = vrot.lane.b32.xlu0 %v262_v10, %s534_s29 }
  0xdf   : > { %313 = vrot.lane.b32.xlu1 %v474_v9, %s535_s30  ;;  %307 = vrot.lane.b32.xlu0 %v262_v10, %s535_s30 }
  0xe3   : > { %326 = vrot.lane.b32.xlu1 %v471_v8, %s536_s3  ;;  %311 = vrot.lane.b32.xlu0 %v272_v11, %s535_s30 }
  0xe7   : > { %294 = vrot.lane.b32.xlu1 %v272_v11, %s534_s29  ;;  %324 = vrot.lane.b32.xlu0 %v262_v10, %s536_s3 }
  0xeb   : > { %330 = vrot.lane.b32.xlu1 %v474_v9, %s536_s3  ;;  %328 = vrot.lane.b32.xlu0 %v272_v11, %s536_s3 }
 0x149   : > { %v297_v12 = vpop.permute.xlu1 %296  ;;  %v293_v13 = vpop.permute.xlu0 %292 }
 0x14a   : > { %440 = vst.msk [vmem:[%s588_s28 + $0x38] sm:$0xff] %vm281_vm1, %v297_v12  ;;  %438 = vst.msk [vmem:[%s588_s28 + $0x28] sm:$0xff] %vm281_vm1, %v293_v13 }
 0x14d   : > { %v310_v14 = vpop.permute.xlu1 %309  ;;  %v291_v15 = vpop.permute.xlu0 %290 }
 0x14e   : > { %442 = vst.msk [vmem:[%s588_s28 + $0x48] sm:$0xff] %vm281_vm1, %v310_v14  ;;  %437 = vst.msk [vmem:[%s588_s28 + $0x20] sm:$0xff] %vm281_vm1, %v291_v15 }
 0x151   : > { %v314_v16 = vpop.permute.xlu1 %313  ;;  %v308_v17 = vpop.permute.xlu0 %307 }
 0x152   : > { %444 = vst.msk [vmem:[%s588_s28 + $0x58] sm:$0xff] %vm281_vm1, %v314_v16  ;;  %441 = vst.msk [vmem:[%s588_s28 + $0x40] sm:$0xff] %vm281_vm1, %v308_v17 }
 0x155   : > { %v327_v18 = vpop.permute.xlu1 %326  ;;  %v312_v19 = vpop.permute.xlu0 %311 }
 0x156   : > { %446 = vst.msk [vmem:[%s588_s28 + $0x68] sm:$0xff] %vm281_vm1, %v327_v18  ;;  %443 = vst.msk [vmem:[%s588_s28 + $0x50] sm:$0xff] %vm281_vm1, %v312_v19 }
 0x159   : > { %v295_v20 = vpop.permute.xlu1 %294  ;;  %v325_v21 = vpop.permute.xlu0 %324 }
 0x15a   : > { %439 = vst.msk [vmem:[%s588_s28 + $0x30] sm:$0xff] %vm281_vm1, %v295_v20  ;;  %445 = vst.msk [vmem:[%s588_s28 + $0x60] sm:$0xff] %vm281_vm1, %v325_v21 }
 0x15d   : > { %v331_v22 = vpop.permute.xlu1 %330  ;;  %v329_v23 = vpop.permute.xlu0 %328 }
 0x15e   : > { %448 = vst.msk [vmem:[%s588_s28 + $0x78] sm:$0xff] %vm281_vm1, %v331_v22  ;;  %447 = vst.msk [vmem:[%s588_s28 + $0x70] sm:$0xff] %vm281_vm1, %v329_v23 }
 0x15f PF: > { %s12_s11 = sadd.s32 1, %s532_s11   ;;  %s634_s9 = smov %s528_s10 }
 0x160   : > { %p9_p5 = scmp.ge.s32.totalorder %s12_s11, 4   ;;  %s635_s10 = smov %s637_s12 }
 0x162   :  { %11 = sbr.rel (!%p9_p5) target bundleno = 2 (0x2), region = 61 }

</bundles_post_ra>
